<compile_context>
chip_gen: v7x
topology: tpu7x:2x2x1
jax: 0.10.0
libtpu: 0.0.40
codegen_flags: <defaults>
</compile_context>

<pallas_src>
import functools

import numpy as np
import jax
import jax.numpy as jnp
from jax import lax
from jax.experimental import pallas as pl
from jax.experimental.pallas import tpu as pltpu


def _ds(start, size, stride=1):
    return pl.ds(start, size) if stride == 1 else pl.ds(start, size, stride)


# ----------------------------------------------------------------------------------------
# Shared lane-dense helpers (H*W merged onto the 128-lane axis).
# ----------------------------------------------------------------------------------------
def _lane_coords(H, W):
    """Lane-index iota and per-lane w coordinate for a (.., H*W) lane-dense layout."""
    HW = H * W
    idx = lax.broadcasted_iota(jnp.int32, (1, HW), 1)
    if W & (W - 1) == 0:
        wc = jnp.bitwise_and(idx, W - 1)
    else:
        # TODO(synk): if Mosaic rejects the vector remainder for non-power-of-two W,
        #             route those shapes through the NHWC fallbacks instead.
        wc = idx % W
    return idx, wc


def _pool3x3_s1_lanes(acc, idx, wc, H, W, mode):
    """3x3 pool, stride 1, padding 1, on a (.., H*W) lane-dense array (XLU rolls + masks)."""
    HW = H * W
    if mode == "max":
        pad = jnp.array(-jnp.inf, acc.dtype)
        op = jnp.maximum
    else:
        pad = jnp.array(0.0, acc.dtype)
        op = jnp.add

    left = jnp.where(wc >= 1, pltpu.roll(acc, 1, axis=1), pad)            # x[h, w-1]
    right = jnp.where(wc <= W - 2, pltpu.roll(acc, HW - 1, axis=1), pad)  # x[h, w+1]
    row = op(op(left, acc), right)

    up = jnp.where(idx >= W, pltpu.roll(row, W, axis=1), pad)                  # row h-1
    down = jnp.where(idx < (H - 1) * W, pltpu.roll(row, HW - W, axis=1), pad)  # row h+1
    out = op(op(up, row), down)

    if mode == "avg":
        # count_include_pad=False divisor, in f32, derived from the same masks
        cw = (1 + (wc >= 1) + (wc <= W - 2)).astype(jnp.float32)
        ch = (1 + (idx >= W) + (idx < (H - 1) * W)).astype(jnp.float32)
        out = out / (cw * ch)
    return out


# ----------------------------------------------------------------------------------------
# Fused ReLU -> Conv3x3 (BN folded) -> 3x3 pool; stride=1, padding=1, lane-dense NCHW.
# Single im2col matmul per image; lane-dense (C_out, H*W) stores.
# ----------------------------------------------------------------------------------------
def _fused_lane_kernel(x_ref, w_ref, b_ref, o_ref, im_s, *, H, W, mode):
    C_in = x_ref.shape[1]
    HW = H * W
    idx, wc = _lane_coords(H, W)

    x = jnp.maximum(x_ref[0].astype(jnp.float32), 0.0)          # ReLU, (C_in, H*W)

    # im2col: 9 shifted+masked taps stacked on the sublane axis -> (9*C_in, H*W)
    t = 0
    for dh in (-1, 0, 1):
        for dw in (-1, 0, 1):
            shift = (-(dh * W + dw)) % HW
            tap = x if shift == 0 else pltpu.roll(x, shift, axis=1)
            conds = []
            if dh < 0:
                conds.append(idx >= (-dh) * W)
            if dh > 0:
                conds.append(idx < (H - dh) * W)
            if dw < 0:
                conds.append(wc >= -dw)
            if dw > 0:
                conds.append(wc < W - dw)
            if conds:
                m = conds[0]
                for c in conds[1:]:
                    m = m & c
                tap = jnp.where(m, tap, 0.0)                     # zero conv padding
            im_s[_ds(t * C_in, C_in), :] = tap
            t += 1

    # single MXU contraction: (C_out, 9*C_in) @ (9*C_in, H*W), + folded-BN bias
    y = jnp.dot(w_ref[...], im_s[...], preferred_element_type=jnp.float32) + b_ref[...]

    # 3x3 pool straight out of vregs; lane-dense NCHW store (no masked vst)
    out = _pool3x3_s1_lanes(y, idx, wc, H, W, mode)
    o_ref[0] = out.astype(o_ref.dtype)


# ----------------------------------------------------------------------------------------
# Pure pooling (C_in == C_out), stride 1: NCHW with H*W on lanes, channel-tiled grid.
# ----------------------------------------------------------------------------------------
def _pool_lane_kernel(x_ref, o_ref, *, H, W, mode):
    idx, wc = _lane_coords(H, W)
    x = x_ref[0]                                  # (c_tile, H*W)
    acc = x if mode == "max" else x.astype(jnp.float32)   # max is exact in native dtype
    out = _pool3x3_s1_lanes(acc, idx, wc, H, W, mode)
    o_ref[0] = out.astype(o_ref.dtype)


# ----------------------------------------------------------------------------------------
# General stride/padding fused fallback: NHWC (channels on lanes), padded VMEM scratch.
# Not exercised by the stride-1 test; kept for full module semantics.
# ----------------------------------------------------------------------------------------
def _fused_prepool_nhwc_kernel(x_ref, w_ref, b_ref, o_ref, xp_s, yp_s, *,
                               stride, padding, H, W, Ho, Wo, Po, Qo, mode):
    # TODO(synk): this fallback still does 9 K=C_in matmuls; an im2col here needs a
    #             minor-dim concat/relayout, so it is left as-is for the rare strided case.
    C_in = x_ref.shape[-1]
    C_out = o_ref.shape[-1]

    # zero only the pad border (interior is fully overwritten every step)
    if padding > 0:
        Hp, Wp = H + 2 * padding, W + 2 * padding
        z = jnp.zeros((padding, Wp, C_in), xp_s.dtype)
        xp_s[_ds(0, padding), :, :] = z
        xp_s[_ds(padding + H, padding), :, :] = z
        z = jnp.zeros((Hp, padding, C_in), xp_s.dtype)
        xp_s[:, _ds(0, padding), :] = z
        xp_s[:, _ds(padding + W, padding), :] = z
    xp_s[_ds(padding, H), _ds(padding, W), :] = jnp.maximum(x_ref[0], 0.0).astype(xp_s.dtype)

    acc = jnp.zeros((Ho * Wo, C_out), jnp.float32)
    for kh in range(3):
        for kw in range(3):
            tap = xp_s[_ds(kh, Ho, stride), _ds(kw, Wo, stride), :]
            acc = acc + jnp.dot(tap.reshape(Ho * Wo, C_in), w_ref[kh * 3 + kw],
                                preferred_element_type=jnp.float32)
    y = acc + b_ref[...]                                   # folded-BN bias

    # pool (kernel=3, padding=1): border-only scratch init, separable kw-then-kh reduce
    pad_val = -jnp.inf if mode == "max" else 0.0
    op = jnp.maximum if mode == "max" else jnp.add
    f = jnp.full((1, Wo + 2, C_out), pad_val, yp_s.dtype)
    yp_s[_ds(0, 1), :, :] = f
    yp_s[_ds(Ho + 1, 1), :, :] = f
    f = jnp.full((Ho + 2, 1, C_out), pad_val, yp_s.dtype)
    yp_s[:, _ds(0, 1), :] = f
    yp_s[:, _ds(Wo + 1, 1), :] = f
    yp_s[_ds(1, Ho), _ds(1, Wo), :] = y.reshape(Ho, Wo, C_out)

    col = yp_s[:, _ds(0, Qo, stride), :]
    for kw in (1, 2):
        col = op(col, yp_s[:, _ds(kw, Qo, stride), :])      # (Ho + 2, Qo, C_out)
    hi = (Po - 1) * stride + 1
    out = col[0:hi:stride]
    for kh in (1, 2):
        out = op(out, col[kh:kh + hi:stride])               # (Po, Qo, C_out)

    if mode == "avg":
        p = lax.broadcasted_iota(jnp.int32, (Po, Qo, 1), 0)
        q = lax.broadcasted_iota(jnp.int32, (Po, Qo, 1), 1)
        cnt_h = jnp.minimum(p * stride + 2, Ho) - jnp.maximum(p * stride - 1, 0)
        cnt_w = jnp.minimum(q * stride + 2, Wo) - jnp.maximum(q * stride - 1, 0)
        out = out / (cnt_h * cnt_w).astype(jnp.float32)

    o_ref[0] = out.astype(o_ref.dtype)


# ----------------------------------------------------------------------------------------
# General stride pure-pool fallback: NHWC (C on lanes -> kw taps are sublane moves).
# ----------------------------------------------------------------------------------------
def _pool_nhwc_kernel(x_ref, o_ref, pad_s, *, stride, H, W, Po, Qo, mode):
    C = x_ref.shape[-1]
    pad_val = -jnp.inf if mode == "max" else 0.0
    op = jnp.maximum if mode == "max" else jnp.add

    # border-only scratch init (interior fully overwritten every step)
    f = jnp.full((1, W + 2, C), pad_val, pad_s.dtype)
    pad_s[_ds(0, 1), :, :] = f
    pad_s[_ds(H + 1, 1), :, :] = f
    f = jnp.full((H + 2, 1, C), pad_val, pad_s.dtype)
    pad_s[:, _ds(0, 1), :] = f
    pad_s[:, _ds(W + 1, 1), :] = f
    pad_s[_ds(1, H), _ds(1, W), :] = x_ref[0].astype(pad_s.dtype)

    col = pad_s[:, _ds(0, Qo, stride), :]
    for kw in (1, 2):
        col = op(col, pad_s[:, _ds(kw, Qo, stride), :])      # (H + 2, Qo, C)
    hi = (Po - 1) * stride + 1
    out = col[0:hi:stride]
    for kh in (1, 2):
        out = op(out, col[kh:kh + hi:stride])                # (Po, Qo, C)

    if mode == "avg":
        p = lax.broadcasted_iota(jnp.int32, (Po, Qo, 1), 0)
        q = lax.broadcasted_iota(jnp.int32, (Po, Qo, 1), 1)
        cnt_h = jnp.minimum(p * stride + 2, H) - jnp.maximum(p * stride - 1, 0)
        cnt_w = jnp.minimum(q * stride + 2, W) - jnp.maximum(q * stride - 1, 0)
        out = out / (cnt_h * cnt_w).astype(jnp.float32)

    o_ref[0] = out.astype(o_ref.dtype)


# ----------------------------------------------------------------------------------------
# Small sizing helpers.
# ----------------------------------------------------------------------------------------
def _vmem_limit(block_bytes, scratch_bytes):
    """Double-buffered blocks + scratch with headroom; below v7x's 64 MiB physical VMEM."""
    est = 2 * block_bytes + scratch_bytes
    return int(min(max(2 * est, 32 * 1024 * 1024), 60 * 1024 * 1024))


def _pick_channel_tile(C, HW, itemsize, budget=4 * 1024 * 1024):
    """Largest channel tile dividing C whose (tile, H*W) block stays under `budget` bytes."""
    if C * HW * itemsize <= budget:
        return C
    best = C
    for cand in (512, 256, 128, 64, 32, 16, 8):
        if C % cand == 0:
            best = cand
            if cand * HW * itemsize <= budget:
                return cand
    return best


# ----------------------------------------------------------------------------------------
# Wrapper: NCHW in / NCHW out, matching the PyTorch module.
# ----------------------------------------------------------------------------------------
def pool_forward(x_nchw, params, *, mode, stride, padding):
    if mode not in ("avg", "max"):
        raise ValueError(f"Invalid mode={mode} in POOLING")
    N, C_in, H, W = x_nchw.shape
    HW = H * W
    dtype = x_nchw.dtype
    if mode == "max":
        assert jnp.issubdtype(dtype, jnp.floating), "max pool kernel needs a floating dtype"

    if params is not None:
        # ---------- fused ReLU -> Conv3x3 -> BN(eval, folded) -> pool: one HBM round trip
        w_hwio, gamma, beta, mean, var, eps = params
        C_out = w_hwio.shape[-1]
        scale = gamma.astype(jnp.float32) * lax.rsqrt(var.astype(jnp.float32) + eps)
        w_scaled = w_hwio.astype(jnp.float32) * scale[None, None, None, :]
        bias_vec = beta.astype(jnp.float32) - mean.astype(jnp.float32) * scale

        Ho = (H + 2 * padding - 3) // stride + 1
        Wo = (W + 2 * padding - 3) // stride + 1
        Po = (Ho - 1) // stride + 1               # 3x3 pool, padding=1
        Qo = (Wo - 1) // stride + 1

        blk = (C_in * HW + C_out * HW) * dtype.itemsize + (9 * C_in * C_out + C_out) * 4
        scr = 9 * C_in * HW * 4
        lane_ok = (stride == 1 and padding == 1 and HW % 128 == 0
                   and 2 * blk + scr < 48 * 1024 * 1024)
        # TODO(synk): layers too large for whole-image VMEM residency should be row-tiled
        #             (grid axis over H with a 2-row halo) instead of falling back.

        if lane_ok:
            # NCHW end-to-end, H*W on lanes; single im2col matmul per image; no transposes.
            x2 = x_nchw.reshape(N, C_in, HW)
            w2d = jnp.transpose(w_scaled, (3, 0, 1, 2)).reshape(C_out, 9 * C_in)
            b2d = bias_vec.reshape(C_out, 1)
            kern = functools.partial(_fused_lane_kernel, H=H, W=W, mode=mode)
            out = pl.pallas_call(
                kern,
                out_shape=jax.ShapeDtypeStruct((N, C_out, HW), dtype),
                grid=(N,),
                in_specs=[
                    pl.BlockSpec((1, C_in, HW), lambda n: (n, 0, 0)),
                    pl.BlockSpec((C_out, 9 * C_in), lambda n: (0, 0)),
                    pl.BlockSpec((C_out, 1), lambda n: (0, 0)),
                ],
                out_specs=pl.BlockSpec((1, C_out, HW), lambda n: (n, 0, 0)),
                scratch_shapes=[pltpu.VMEM((9 * C_in, HW), jnp.float32)],
                compiler_params=pltpu.CompilerParams(
                    dimension_semantics=("parallel",),
                    vmem_limit_bytes=_vmem_limit(blk, scr)),
            )(x2, w2d, b2d)
            return out.reshape(N, C_out, Po, Qo)

        # general stride/padding fallback: NHWC whole-image blocks
        x = jnp.transpose(x_nchw, (0, 2, 3, 1))
        w9 = w_scaled.reshape(9, C_in, C_out)
        b1 = bias_vec.reshape(1, C_out)
        scr = ((H + 2 * padding) * (W + 2 * padding) * C_in
               + (Ho + 2) * (Wo + 2) * C_out) * 4
        blk = (H * W * C_in + Po * Qo * C_out) * dtype.itemsize + (9 * C_in * C_out + C_out) * 4
        kern = functools.partial(_fused_prepool_nhwc_kernel, stride=stride, padding=padding,
                                 H=H, W=W, Ho=Ho, Wo=Wo, Po=Po, Qo=Qo, mode=mode)
        out = pl.pallas_call(
            kern,
            out_shape=jax.ShapeDtypeStruct((N, Po, Qo, C_out), dtype),
            grid=(N,),
            in_specs=[
                pl.BlockSpec((1, H, W, C_in), lambda n: (n, 0, 0, 0)),
                pl.BlockSpec((9, C_in, C_out), lambda n: (0, 0, 0)),
                pl.BlockSpec((1, C_out), lambda n: (0, 0)),
            ],
            out_specs=pl.BlockSpec((1, Po, Qo, C_out), lambda n: (n, 0, 0, 0)),
            scratch_shapes=[
                pltpu.VMEM((H + 2 * padding, W + 2 * padding, C_in), jnp.float32),
                pltpu.VMEM((Ho + 2, Wo + 2, C_out), jnp.float32),
            ],
            compiler_params=pltpu.CompilerParams(
                dimension_semantics=("parallel",),
                vmem_limit_bytes=_vmem_limit(blk, scr)),
        )(x, w9, b1)
        return jnp.transpose(out, (0, 3, 1, 2))

    # ---------------------- pure pooling (C_in == C_out) --------------------------------
    C = C_in
    Po = (H - 1) // stride + 1
    Qo = (W - 1) // stride + 1

    if stride == 1 and HW % 128 == 0:
        # NCHW-native, H*W on lanes, channel-tiled grid (2nd parallel axis for megacore).
        c_tile = _pick_channel_tile(C, HW, dtype.itemsize)
        x2 = x_nchw.reshape(N, C, HW)
        blk = 2 * c_tile * HW * dtype.itemsize
        kern = functools.partial(_pool_lane_kernel, H=H, W=W, mode=mode)
        out = pl.pallas_call(
            kern,
            out_shape=jax.ShapeDtypeStruct((N, C, HW), dtype),
            grid=(N, C // c_tile),
            in_specs=[pl.BlockSpec((1, c_tile, HW), lambda n, c: (n, c, 0))],
            out_specs=pl.BlockSpec((1, c_tile, HW), lambda n, c: (n, c, 0)),
            compiler_params=pltpu.CompilerParams(
                dimension_semantics=("parallel", "parallel"),
                vmem_limit_bytes=_vmem_limit(blk, 0)),
        )(x2)
        return out.reshape(N, C, Po, Qo)

    # general-stride fallback: NHWC so kw taps are sublane moves (C stays on lanes)
    # TODO(synk): the two wrapper transposes cost an extra HBM pass each; a strided
    #             NCHW lane-subsampling version would need an in-kernel lane gather.
    xh = jnp.transpose(x_nchw, (0, 2, 3, 1))
    sdtype = dtype if mode == "max" else jnp.float32
    blk = (H * W * C + Po * Qo * C) * dtype.itemsize
    scr = (H + 2) * (W + 2) * C * jnp.dtype(sdtype).itemsize
    kern = functools.partial(_pool_nhwc_kernel, stride=stride, H=H, W=W,
                             Po=Po, Qo=Qo, mode=mode)
    out = pl.pallas_call(
        kern,
        out_shape=jax.ShapeDtypeStruct((N, Po, Qo, C), dtype),
        grid=(N,),
        in_specs=[pl.BlockSpec((1, H, W, C), lambda n: (n, 0, 0, 0))],
        out_specs=pl.BlockSpec((1, Po, Qo, C), lambda n: (n, 0, 0, 0)),
        scratch_shapes=[pltpu.VMEM((H + 2, W + 2, C), sdtype)],
        compiler_params=pltpu.CompilerParams(
            dimension_semantics=("parallel",),
            vmem_limit_bytes=_vmem_limit(blk, scr)),
    )(xh)
    return jnp.transpose(out, (0, 3, 1, 2))


# ---------------- pure-JAX reference (for correctness check) ----------------------------
def reference(x_nchw, params, *, mode, stride, padding):
    y = x_nchw
    if params is not None:
        w_hwio, gamma, beta, mean, var, eps = params
        w_oihw = jnp.transpose(w_hwio, (3, 2, 0, 1))
        y = jnp.maximum(y, 0.0)
        y = lax.conv_general_dilated(
            y, w_oihw, (stride, stride),
            [(padding, padding), (padding, padding)],
            dimension_numbers=("NCHW", "OIHW", "NCHW"))
        scale = (gamma / jnp.sqrt(var + eps))[None, :, None, None]
        y = (y - mean[None, :, None, None]) * scale + beta[None, :, None, None]
    if mode == "max":
        return lax.reduce_window(y, -jnp.inf, lax.max,
                                 (1, 1, 3, 3), (1, 1, stride, stride),
                                 [(0, 0), (0, 0), (1, 1), (1, 1)])
    s = lax.reduce_window(y, 0.0, lax.add,
                          (1, 1, 3, 3), (1, 1, stride, stride),
                          [(0, 0), (0, 0), (1, 1), (1, 1)])
    c = lax.reduce_window(jnp.ones_like(y), 0.0, lax.add,
                          (1, 1, 3, 3), (1, 1, stride, stride),
                          [(0, 0), (0, 0), (1, 1), (1, 1)])
    return s / c


if __name__ == "__main__":
    key = jax.random.PRNGKey(0)
    kx, kw = jax.random.split(key)

    N, C_in, H, W = 2, 4, 16, 16
    C_out = 8
    stride, padding = 1, 1

    x = jax.random.normal(kx, (N, C_in, H, W), jnp.float32)

    # deterministic "Pool(mode, C_in=4, C_out=8, stride=1, affine=True, padding=1)" params
    w_hwio = 0.1 * jax.random.normal(kw, (3, 3, C_in, C_out), jnp.float32)
    gamma = jnp.linspace(0.5, 1.5, C_out, dtype=jnp.float32)
    beta = jnp.linspace(-0.1, 0.1, C_out, dtype=jnp.float32)
    mean = jnp.linspace(-0.05, 0.05, C_out, dtype=jnp.float32)
    var = jnp.linspace(0.9, 1.1, C_out, dtype=jnp.float32)
    params = (w_hwio, gamma, beta, mean, var, 1e-5)

    cases = [
        ("avg", params),   # fused ReLU->Conv->BN->avg-pool (C_in != C_out), lane-dense path
        ("max", params),   # fused ReLU->Conv->BN->max-pool, lane-dense path
        ("avg", None),     # pure avg pool, NCHW-native lane-dense kernel
        ("max", None),     # pure max pool, NCHW-native lane-dense kernel
    ]
    for mode, p in cases:
        out = jax.block_until_ready(
            pool_forward(x, p, mode=mode, stride=stride, padding=padding))
        ref = reference(x, p, mode=mode, stride=stride, padding=padding)
        expected_c = C_out if p is not None else C_in
        assert out.shape == (N, expected_c, H, W)
        np.testing.assert_allclose(np.asarray(out), np.asarray(ref), rtol=1e-4, atol=1e-4)

    print("KERNEL_OK")
</pallas_src>

<mosaic_0001>
module attributes {stable_mosaic.version = 11 : i64} {
  func.func @_fused_lane_kernel(%arg0: i32, %arg1: memref<1x4x256xf32, #tpu.memory_space<vmem>>, %arg2: memref<8x36xf32, #tpu.memory_space<vmem>>, %arg3: memref<8x1xf32, #tpu.memory_space<vmem>>, %arg4: memref<1x8x256xf32, #tpu.memory_space<vmem>>, %arg5: memref<36x256xf32, #tpu.memory_space<vmem>>) attributes {dimension_semantics = [#tpu.dimension_semantics<parallel>], iteration_bounds = array<i64: 2>, scalar_prefetch = 0 : i64, scratch_operands = 1 : i64, tpu.core_type = #tpu.core_type<tc>, window_params = [{transform_indices = @transform_0, window_bounds = array<i64: 1, 4, 256>}, {pipeline_mode = #tpu.pipeline_mode<synchronous>, transform_indices = @transform_1, window_bounds = array<i64: 8, 36>}, {pipeline_mode = #tpu.pipeline_mode<synchronous>, transform_indices = @transform_2, window_bounds = array<i64: 8, 1>}, {transform_indices = @transform_3, window_bounds = array<i64: 1, 8, 256>}]} {
    %0 = tpu.iota {dimensions = array<i32: 1>} : vector<1x256xi32>
    %c15_i32 = arith.constant 15 : i32
    %1 = vector.broadcast %c15_i32 : i32 to vector<1x256xi32>
    %2 = arith.andi %0, %1 : vector<1x256xi32>
    %c0 = arith.constant 0 : index
    %c0_0 = arith.constant 0 : index
    %c0_1 = arith.constant 0 : index
    %3 = vector.load %arg1[%c0, %c0_0, %c0_1] : memref<1x4x256xf32, #tpu.memory_space<vmem>>, vector<1x4x256xf32>
    %4 = vector.shape_cast %3 : vector<1x4x256xf32> to vector<4x256xf32>
    %cst = arith.constant 0.000000e+00 : f32
    %5 = vector.broadcast %cst : f32 to vector<4x256xf32>
    %6 = arith.maximumf %4, %5 : vector<4x256xf32>
    %c17_i32 = arith.constant 17 : i32
    %7 = tpu.dynamic_rotate %6 by %c17_i32 dim 1 : vector<4x256xf32>, i32 -> vector<4x256xf32>
    %c16_i32 = arith.constant 16 : i32
    %8 = vector.broadcast %c16_i32 : i32 to vector<1x256xi32>
    %9 = arith.cmpi sge, %0, %8 : vector<1x256xi32>
    %c1_i32 = arith.constant 1 : i32
    %10 = vector.broadcast %c1_i32 : i32 to vector<1x256xi32>
    %11 = arith.cmpi sge, %2, %10 : vector<1x256xi32>
    %12 = arith.andi %9, %11 : vector<1x256xi1>
    %cst_2 = arith.constant 0.000000e+00 : f32
    %13 = vector.shape_cast %12 : vector<1x256xi1> to vector<1x256xi1>
    %14 = vector.broadcast %13 : vector<1x256xi1> to vector<4x256xi1>
    %15 = vector.broadcast %cst_2 : f32 to vector<4x256xf32>
    %16 = arith.select %14, %7, %15 : vector<4x256xi1>, vector<4x256xf32>
    %c0_3 = arith.constant 0 : index
    %c0_4 = arith.constant 0 : index
    %17 = vector.load %arg5[%c0_3, %c0_4] : memref<36x256xf32, #tpu.memory_space<vmem>>, vector<4x256xf32>
    tpu.vector_store %arg5[%c0_3, %c0_4], %16 {strides = array<i32>} : memref<36x256xf32, #tpu.memory_space<vmem>>, vector<4x256xf32>,
    %c16_i32_5 = arith.constant 16 : i32
    %18 = tpu.dynamic_rotate %6 by %c16_i32_5 dim 1 : vector<4x256xf32>, i32 -> vector<4x256xf32>
    %c16_i32_6 = arith.constant 16 : i32
    %19 = vector.broadcast %c16_i32_6 : i32 to vector<1x256xi32>
    %20 = arith.cmpi sge, %0, %19 : vector<1x256xi32>
    %cst_7 = arith.constant 0.000000e+00 : f32
    %21 = vector.shape_cast %20 : vector<1x256xi1> to vector<1x256xi1>
    %22 = vector.broadcast %21 : vector<1x256xi1> to vector<4x256xi1>
    %23 = vector.broadcast %cst_7 : f32 to vector<4x256xf32>
    %24 = arith.select %22, %18, %23 : vector<4x256xi1>, vector<4x256xf32>
    %c4 = arith.constant 4 : index
    %c0_8 = arith.constant 0 : index
    %25 = vector.load %arg5[%c4, %c0_8] : memref<36x256xf32, #tpu.memory_space<vmem>>, vector<4x256xf32>
    tpu.vector_store %arg5[%c4, %c0_8], %24 {strides = array<i32>} : memref<36x256xf32, #tpu.memory_space<vmem>>, vector<4x256xf32>,
    %c15_i32_9 = arith.constant 15 : i32
    %26 = tpu.dynamic_rotate %6 by %c15_i32_9 dim 1 : vector<4x256xf32>, i32 -> vector<4x256xf32>
    %c16_i32_10 = arith.constant 16 : i32
    %27 = vector.broadcast %c16_i32_10 : i32 to vector<1x256xi32>
    %28 = arith.cmpi sge, %0, %27 : vector<1x256xi32>
    %c15_i32_11 = arith.constant 15 : i32
    %29 = vector.broadcast %c15_i32_11 : i32 to vector<1x256xi32>
    %30 = arith.cmpi slt, %2, %29 : vector<1x256xi32>
    %31 = arith.andi %28, %30 : vector<1x256xi1>
    %cst_12 = arith.constant 0.000000e+00 : f32
    %32 = vector.shape_cast %31 : vector<1x256xi1> to vector<1x256xi1>
    %33 = vector.broadcast %32 : vector<1x256xi1> to vector<4x256xi1>
    %34 = vector.broadcast %cst_12 : f32 to vector<4x256xf32>
    %35 = arith.select %33, %26, %34 : vector<4x256xi1>, vector<4x256xf32>
    %c8 = arith.constant 8 : index
    %c0_13 = arith.constant 0 : index
    %36 = vector.load %arg5[%c8, %c0_13] : memref<36x256xf32, #tpu.memory_space<vmem>>, vector<4x256xf32>
    tpu.vector_store %arg5[%c8, %c0_13], %35 {strides = array<i32>} : memref<36x256xf32, #tpu.memory_space<vmem>>, vector<4x256xf32>,
    %c1_i32_14 = arith.constant 1 : i32
    %37 = tpu.dynamic_rotate %6 by %c1_i32_14 dim 1 : vector<4x256xf32>, i32 -> vector<4x256xf32>
    %c1_i32_15 = arith.constant 1 : i32
    %38 = vector.broadcast %c1_i32_15 : i32 to vector<1x256xi32>
    %39 = arith.cmpi sge, %2, %38 : vector<1x256xi32>
    %cst_16 = arith.constant 0.000000e+00 : f32
    %40 = vector.shape_cast %39 : vector<1x256xi1> to vector<1x256xi1>
    %41 = vector.broadcast %40 : vector<1x256xi1> to vector<4x256xi1>
    %42 = vector.broadcast %cst_16 : f32 to vector<4x256xf32>
    %43 = arith.select %41, %37, %42 : vector<4x256xi1>, vector<4x256xf32>
    %c12 = arith.constant 12 : index
    %c0_17 = arith.constant 0 : index
    %44 = vector.load %arg5[%c12, %c0_17] : memref<36x256xf32, #tpu.memory_space<vmem>>, vector<4x256xf32>
    tpu.vector_store %arg5[%c12, %c0_17], %43 {strides = array<i32>} : memref<36x256xf32, #tpu.memory_space<vmem>>, vector<4x256xf32>,
    %c16 = arith.constant 16 : index
    %c0_18 = arith.constant 0 : index
    %45 = vector.load %arg5[%c16, %c0_18] : memref<36x256xf32, #tpu.memory_space<vmem>>, vector<4x256xf32>
    tpu.vector_store %arg5[%c16, %c0_18], %6 {strides = array<i32>} : memref<36x256xf32, #tpu.memory_space<vmem>>, vector<4x256xf32>,
    %c255_i32 = arith.constant 255 : i32
    %46 = tpu.dynamic_rotate %6 by %c255_i32 dim 1 : vector<4x256xf32>, i32 -> vector<4x256xf32>
    %c15_i32_19 = arith.constant 15 : i32
    %47 = vector.broadcast %c15_i32_19 : i32 to vector<1x256xi32>
    %48 = arith.cmpi slt, %2, %47 : vector<1x256xi32>
    %cst_20 = arith.constant 0.000000e+00 : f32
    %49 = vector.shape_cast %48 : vector<1x256xi1> to vector<1x256xi1>
    %50 = vector.broadcast %49 : vector<1x256xi1> to vector<4x256xi1>
    %51 = vector.broadcast %cst_20 : f32 to vector<4x256xf32>
    %52 = arith.select %50, %46, %51 : vector<4x256xi1>, vector<4x256xf32>
    %c20 = arith.constant 20 : index
    %c0_21 = arith.constant 0 : index
    %53 = vector.load %arg5[%c20, %c0_21] : memref<36x256xf32, #tpu.memory_space<vmem>>, vector<4x256xf32>
    tpu.vector_store %arg5[%c20, %c0_21], %52 {strides = array<i32>} : memref<36x256xf32, #tpu.memory_space<vmem>>, vector<4x256xf32>,
    %c241_i32 = arith.constant 241 : i32
    %54 = tpu.dynamic_rotate %6 by %c241_i32 dim 1 : vector<4x256xf32>, i32 -> vector<4x256xf32>
    %c240_i32 = arith.constant 240 : i32
    %55 = vector.broadcast %c240_i32 : i32 to vector<1x256xi32>
    %56 = arith.cmpi slt, %0, %55 : vector<1x256xi32>
    %c1_i32_22 = arith.constant 1 : i32
    %57 = vector.broadcast %c1_i32_22 : i32 to vector<1x256xi32>
    %58 = arith.cmpi sge, %2, %57 : vector<1x256xi32>
    %59 = arith.andi %56, %58 : vector<1x256xi1>
    %cst_23 = arith.constant 0.000000e+00 : f32
    %60 = vector.shape_cast %59 : vector<1x256xi1> to vector<1x256xi1>
    %61 = vector.broadcast %60 : vector<1x256xi1> to vector<4x256xi1>
    %62 = vector.broadcast %cst_23 : f32 to vector<4x256xf32>
    %63 = arith.select %61, %54, %62 : vector<4x256xi1>, vector<4x256xf32>
    %c24 = arith.constant 24 : index
    %c0_24 = arith.constant 0 : index
    %64 = vector.load %arg5[%c24, %c0_24] : memref<36x256xf32, #tpu.memory_space<vmem>>, vector<4x256xf32>
    tpu.vector_store %arg5[%c24, %c0_24], %63 {strides = array<i32>} : memref<36x256xf32, #tpu.memory_space<vmem>>, vector<4x256xf32>,
    %c240_i32_25 = arith.constant 240 : i32
    %65 = tpu.dynamic_rotate %6 by %c240_i32_25 dim 1 : vector<4x256xf32>, i32 -> vector<4x256xf32>
    %c240_i32_26 = arith.constant 240 : i32
    %66 = vector.broadcast %c240_i32_26 : i32 to vector<1x256xi32>
    %67 = arith.cmpi slt, %0, %66 : vector<1x256xi32>
    %cst_27 = arith.constant 0.000000e+00 : f32
    %68 = vector.shape_cast %67 : vector<1x256xi1> to vector<1x256xi1>
    %69 = vector.broadcast %68 : vector<1x256xi1> to vector<4x256xi1>
    %70 = vector.broadcast %cst_27 : f32 to vector<4x256xf32>
    %71 = arith.select %69, %65, %70 : vector<4x256xi1>, vector<4x256xf32>
    %c28 = arith.constant 28 : index
    %c0_28 = arith.constant 0 : index
    %72 = vector.load %arg5[%c28, %c0_28] : memref<36x256xf32, #tpu.memory_space<vmem>>, vector<4x256xf32>
    tpu.vector_store %arg5[%c28, %c0_28], %71 {strides = array<i32>} : memref<36x256xf32, #tpu.memory_space<vmem>>, vector<4x256xf32>,
    %c239_i32 = arith.constant 239 : i32
    %73 = tpu.dynamic_rotate %6 by %c239_i32 dim 1 : vector<4x256xf32>, i32 -> vector<4x256xf32>
    %c240_i32_29 = arith.constant 240 : i32
    %74 = vector.broadcast %c240_i32_29 : i32 to vector<1x256xi32>
    %75 = arith.cmpi slt, %0, %74 : vector<1x256xi32>
    %c15_i32_30 = arith.constant 15 : i32
    %76 = vector.broadcast %c15_i32_30 : i32 to vector<1x256xi32>
    %77 = arith.cmpi slt, %2, %76 : vector<1x256xi32>
    %78 = arith.andi %75, %77 : vector<1x256xi1>
    %cst_31 = arith.constant 0.000000e+00 : f32
    %79 = vector.shape_cast %78 : vector<1x256xi1> to vector<1x256xi1>
    %80 = vector.broadcast %79 : vector<1x256xi1> to vector<4x256xi1>
    %81 = vector.broadcast %cst_31 : f32 to vector<4x256xf32>
    %82 = arith.select %80, %73, %81 : vector<4x256xi1>, vector<4x256xf32>
    %c32 = arith.constant 32 : index
    %c0_32 = arith.constant 0 : index
    %83 = vector.load %arg5[%c32, %c0_32] : memref<36x256xf32, #tpu.memory_space<vmem>>, vector<4x256xf32>
    tpu.vector_store %arg5[%c32, %c0_32], %82 {strides = array<i32>} : memref<36x256xf32, #tpu.memory_space<vmem>>, vector<4x256xf32>,
    %c0_33 = arith.constant 0 : index
    %c0_34 = arith.constant 0 : index
    %84 = vector.load %arg2[%c0_33, %c0_34] : memref<8x36xf32, #tpu.memory_space<vmem>>, vector<8x36xf32>
    %c0_35 = arith.constant 0 : index
    %c0_36 = arith.constant 0 : index
    %85 = vector.load %arg5[%c0_35, %c0_36] : memref<36x256xf32, #tpu.memory_space<vmem>>, vector<36x256xf32>
    %cst_37 = arith.constant dense<0.000000e+00> : vector<8x256xf32>
    %86 = tpu.matmul %84, %85, %cst_37 {dimension_numbers = #tpu.dot_dimension_numbers<[1], [0], [0], [1], [0, 0, 1, 1], [], []>} : vector<8x36xf32>, vector<36x256xf32>, vector<8x256xf32> -> vector<8x256xf32>
    %c0_38 = arith.constant 0 : index
    %c0_39 = arith.constant 0 : index
    %87 = vector.load %arg3[%c0_38, %c0_39] : memref<8x1xf32, #tpu.memory_space<vmem>>, vector<8x1xf32>
    %88 = vector.broadcast %87 : vector<8x1xf32> to vector<8x256xf32>
    %89 = arith.addf %86, %88 : vector<8x256xf32>
    %c1_i32_40 = arith.constant 1 : i32
    %90 = vector.broadcast %c1_i32_40 : i32 to vector<1x256xi32>
    %91 = arith.cmpi sge, %2, %90 : vector<1x256xi32>
    %c1_i32_41 = arith.constant 1 : i32
    %92 = tpu.dynamic_rotate %89 by %c1_i32_41 dim 1 : vector<8x256xf32>, i32 -> vector<8x256xf32>
    %cst_42 = arith.constant 0.000000e+00 : f32
    %93 = vector.shape_cast %91 : vector<1x256xi1> to vector<1x256xi1>
    %94 = vector.broadcast %93 : vector<1x256xi1> to vector<8x256xi1>
    %95 = vector.broadcast %cst_42 : f32 to vector<8x256xf32>
    %96 = arith.select %94, %92, %95 : vector<8x256xi1>, vector<8x256xf32>
    %c14_i32 = arith.constant 14 : i32
    %97 = vector.broadcast %c14_i32 : i32 to vector<1x256xi32>
    %98 = arith.cmpi sle, %2, %97 : vector<1x256xi32>
    %c255_i32_43 = arith.constant 255 : i32
    %99 = tpu.dynamic_rotate %89 by %c255_i32_43 dim 1 : vector<8x256xf32>, i32 -> vector<8x256xf32>
    %cst_44 = arith.constant 0.000000e+00 : f32
    %100 = vector.shape_cast %98 : vector<1x256xi1> to vector<1x256xi1>
    %101 = vector.broadcast %100 : vector<1x256xi1> to vector<8x256xi1>
    %102 = vector.broadcast %cst_44 : f32 to vector<8x256xf32>
    %103 = arith.select %101, %99, %102 : vector<8x256xi1>, vector<8x256xf32>
    %104 = arith.addf %96, %89 : vector<8x256xf32>
    %105 = arith.addf %104, %103 : vector<8x256xf32>
    %c16_i32_45 = arith.constant 16 : i32
    %106 = vector.broadcast %c16_i32_45 : i32 to vector<1x256xi32>
    %107 = arith.cmpi sge, %0, %106 : vector<1x256xi32>
    %c16_i32_46 = arith.constant 16 : i32
    %108 = tpu.dynamic_rotate %105 by %c16_i32_46 dim 1 : vector<8x256xf32>, i32 -> vector<8x256xf32>
    %cst_47 = arith.constant 0.000000e+00 : f32
    %109 = vector.shape_cast %107 : vector<1x256xi1> to vector<1x256xi1>
    %110 = vector.broadcast %109 : vector<1x256xi1> to vector<8x256xi1>
    %111 = vector.broadcast %cst_47 : f32 to vector<8x256xf32>
    %112 = arith.select %110, %108, %111 : vector<8x256xi1>, vector<8x256xf32>
    %c240_i32_48 = arith.constant 240 : i32
    %113 = vector.broadcast %c240_i32_48 : i32 to vector<1x256xi32>
    %114 = arith.cmpi slt, %0, %113 : vector<1x256xi32>
    %c240_i32_49 = arith.constant 240 : i32
    %115 = tpu.dynamic_rotate %105 by %c240_i32_49 dim 1 : vector<8x256xf32>, i32 -> vector<8x256xf32>
    %cst_50 = arith.constant 0.000000e+00 : f32
    %116 = vector.shape_cast %114 : vector<1x256xi1> to vector<1x256xi1>
    %117 = vector.broadcast %116 : vector<1x256xi1> to vector<8x256xi1>
    %118 = vector.broadcast %cst_50 : f32 to vector<8x256xf32>
    %119 = arith.select %117, %115, %118 : vector<8x256xi1>, vector<8x256xf32>
    %120 = arith.addf %112, %105 : vector<8x256xf32>
    %121 = arith.addf %120, %119 : vector<8x256xf32>
    %c1_i32_51 = arith.constant 1 : i32
    %122 = vector.broadcast %c1_i32_51 : i32 to vector<1x256xi32>
    %123 = arith.cmpi sge, %2, %122 : vector<1x256xi32>
    %124 = arith.extui %123 : vector<1x256xi1> to vector<1x256xi32>
    %c1_i32_52 = arith.constant 1 : i32
    %125 = vector.broadcast %c1_i32_52 : i32 to vector<1x256xi32>
    %126 = arith.addi %125, %124 : vector<1x256xi32>
    %c14_i32_53 = arith.constant 14 : i32
    %127 = vector.broadcast %c14_i32_53 : i32 to vector<1x256xi32>
    %128 = arith.cmpi sle, %2, %127 : vector<1x256xi32>
    %129 = arith.extui %128 : vector<1x256xi1> to vector<1x256xi32>
    %130 = arith.addi %126, %129 : vector<1x256xi32>
    %131 = arith.sitofp %130 : vector<1x256xi32> to vector<1x256xf32>
    %c16_i32_54 = arith.constant 16 : i32
    %132 = vector.broadcast %c16_i32_54 : i32 to vector<1x256xi32>
    %133 = arith.cmpi sge, %0, %132 : vector<1x256xi32>
    %134 = arith.extui %133 : vector<1x256xi1> to vector<1x256xi32>
    %c1_i32_55 = arith.constant 1 : i32
    %135 = vector.broadcast %c1_i32_55 : i32 to vector<1x256xi32>
    %136 = arith.addi %135, %134 : vector<1x256xi32>
    %c240_i32_56 = arith.constant 240 : i32
    %137 = vector.broadcast %c240_i32_56 : i32 to vector<1x256xi32>
    %138 = arith.cmpi slt, %0, %137 : vector<1x256xi32>
    %139 = arith.extui %138 : vector<1x256xi1> to vector<1x256xi32>
    %140 = arith.addi %136, %139 : vector<1x256xi32>
    %141 = arith.sitofp %140 : vector<1x256xi32> to vector<1x256xf32>
    %142 = arith.mulf %131, %141 : vector<1x256xf32>
    %143 = vector.broadcast %142 : vector<1x256xf32> to vector<8x256xf32>
    %144 = arith.divf %121, %143 : vector<8x256xf32>
    %c0_57 = arith.constant 0 : index
    %c0_58 = arith.constant 0 : index
    %c0_59 = arith.constant 0 : index
    %145 = vector.load %arg4[%c0_57, %c0_58, %c0_59] : memref<1x8x256xf32, #tpu.memory_space<vmem>>, vector<1x8x256xf32>
    %146 = vector.shape_cast %145 : vector<1x8x256xf32> to vector<8x256xf32>
    %147 = vector.shape_cast %144 : vector<8x256xf32> to vector<1x8x256xf32>
    tpu.vector_store %arg4[%c0_57, %c0_58, %c0_59], %147 {strides = array<i32>} : memref<1x8x256xf32, #tpu.memory_space<vmem>>, vector<1x8x256xf32>,
    return
  }
  func.func @transform_0(%arg0: i32) -> (i32, i32, i32) {
    %c0_i32 = arith.constant 0 : i32
    %c0_i32_0 = arith.constant 0 : i32
    %c0_i32_1 = arith.constant 0 : i32
    return %arg0, %c0_i32, %c0_i32_0 : i32, i32, i32
  }
  func.func @transform_1(%arg0: i32) -> (i32, i32) {
    %c0_i32 = arith.constant 0 : i32
    %c0_i32_0 = arith.constant 0 : i32
    %c0_i32_1 = arith.constant 0 : i32
    return %c0_i32, %c0_i32_0 : i32, i32
  }
  func.func @transform_2(%arg0: i32) -> (i32, i32) {
    %c0_i32 = arith.constant 0 : i32
    %c0_i32_0 = arith.constant 0 : i32
    %c0_i32_1 = arith.constant 0 : i32
    return %c0_i32, %c0_i32_0 : i32, i32
  }
  func.func @transform_3(%arg0: i32) -> (i32, i32, i32) {
    %c0_i32 = arith.constant 0 : i32
    %c0_i32_0 = arith.constant 0 : i32
    %c0_i32_1 = arith.constant 0 : i32
    return %arg0, %c0_i32, %c0_i32_0 : i32, i32, i32
  }
}

</mosaic_0001>

<bundles_post_ra>
// kernel: tpu_custom_call.1
= control target key start
LH: loop header
LB: loop body
LE: loop exit
PB: predicated region body
PF: predicated region fallthrough
CT: control target
= control target key end

     0   :  { %8 = vsyncpa [#allocation4], 0  ;;  %s1143_s0 = inlined_call_operand.hbm [shape: f32[2,4,256], index: 0, kind: input, shape index: {}]   ;;  %s1144_s1 = inlined_call_operand.vmem [shape: f32[8,36], index: 1, kind: input, shape index: {}]   ;;  %s1145_s2 = inlined_call_operand.vmem [shape: f32[8,1], index: 2, kind: input, shape index: {}]   ;;  %s1146_s3 = inlined_call_operand.hbm [shape: f32[2,8,256], index: 3, kind: output, shape index: {}]  }
   0x1   :  { %10 = vsyncpa [#allocation4 + $0x1], 0 }
   0x2   :  { %11 = vsyncpa [#allocation5], 0 }
   0x3   :  { %13 = vsyncpa [#allocation5 + $0x1], 0  ;;  %s827_s12 = smov 0   ;;  %s829_s13 = smov 0  }
   0x4   :  { %s831_s14 = smov 0   ;;  %s833_s15 = smov 0  }
   0x5 LB: > { %s848_s16 = sadd.s32 4294967295, %s793_s15   ;;  %s609_s17 = sadd.s32 4294967294, %s793_s15   ;;  %s793_s15 = sphi %s833_s15, %s1163_s15   ;;  %s789_s14 = sphi %s831_s14, %s1162_s14   ;;  %s785_s13 = sphi %s829_s13, %s1161_s13   ;;  %s781_s12 = sphi %s827_s12, %s1160_s12  }
   0x6   : > { %s852_s18 = sadd.s32 1, %s793_s15   ;;  %s26_s19 = sadd.s32 1, %s789_s14 }
   0x7   : > { %s23_s20 = ssub.s32 %s793_s15, %s852_s18  ;;  %p33_p0 = scmp.ne.s32.totalorder %s789_s14, %s785_s13 }
   0x8   : > { %p24_p1 = scmp.eq.s32.totalorder %s23_s20, 0  ;;  %p34_p2 = scmp.eq.s32.totalorder %s793_s15, 0 }
   0x9   : > { %p39_p3 = scmp.ne.s32.totalorder %s785_s13, %s781_s12  ;;  %p40_p4 = scmp.eq.s32.totalorder %s848_s16, 0 }
   0xa   : > { %s864_s21 = scalar_select %p24_p1, %s789_s14, %s26_s19  }
   0xb   : > { %p866_p5 = por %p34_p2, %p33_p0  ;;  %p870_p6 = por %p40_p4, %p39_p3 }
   0xc   : > { %p105_p7 = scmp.eq.s32.totalorder %s848_s16, 1  ;;  %p111_p8 = scmp.eq.s32.totalorder %s609_s17, 1 }
   0xd   : > { %p648_p10 = scmp.lt.s32.totalorder %s793_s15, 2  ;;  %s137_s26 = sand.u32 1, %s789_s14  }
   0xe   : > { %p877_p11 = por %p105_p7, %p33_p0  ;;  %p881_p12 = por %p111_p8, %p39_p3 }
   0xf   : > { %s626_s27 = sshll.u32 %s793_s15, 7  ;;  %s612_s28 = sshll.u32 %s137_s26, 3 }
  0x10   : > { %s1150_s24 = scalar_select %p877_p11, 1, 0 }
  0x11   : > { %s1151_s25 = scalar_select %p881_p12, 1, 0 }
  0x12   : > { %s890_s4 = scalar_lea.hbm %s1143_s0, %s626_s27  ;;  %s141_s5 = scalar_lea.vmem [#allocation3], %s612_s28 }
  0x13   : > { %s149_s6 = sshll.u32 %s141_s5, 4  ;;  %p894_p13 = pnand %p648_p10, %p866_p5  ;;  %s898_s6 = int_to_ptr.vmem [resolvable:$true] %s149_s6 }
  0x14   : > { %s138_s8 = scalar_lea.sflag [#allocation4], %s137_s26  ;;  %s697_s9 = scalar_lea.hbm %s890_s4, 128 }
  0x15   : > { %p698_p2 = scmp.ne.s32.totalorder %s890_s4, %s697_s9  ;;  %p699_p3 = pneg %p894_p13 }
  0x16   : > { %s702_s17 = scalar_lea.hbm %s1143_s0, 256  ;;  %p703_p5 = scmp.lt.u32.totalorder %s890_s4, %s1143_s0 }
  0x17   : > { %p700_p4 = pnand %p699_p3, %p698_p2  ;;  %p704_p8 = scmp.lt.u32.totalorder %s702_s17, %s697_s9 }
  0x18   : > { %p706_p9 = scmp.lt.u32.totalorder %s697_s9, %s890_s4 }
  0x19   : > { %p701_p7 = pneg %p700_p4  ;;  %p705_p10 = por %p704_p8, %p703_p5 }
  0x1b   : > { %p707_p0 = por %p706_p9, %p705_p10 }
  0x1d   : > { %p708_p1 = pnand %p707_p0, %p701_p7 }
  0x1f   : > { %711 = shalt.err (!%p708_p1)
}
  0x20   : > { %s712_s22 = scalar_lea.vmem %s898_s6, 128  ;;  %s795_s26 = smov [#allocation3]  }
  0x21   : > { %p713_p2 = scmp.ne.s32.totalorder %s898_s6, %s712_s22  ;;  %s717_s27 = sshll.u32 %s795_s26, 4  ;;  %s718_s27 = int_to_ptr.vmem [resolvable:$false] %s717_s27 }
  0x22   : > { %s719_s28 = scalar_lea.vmem %s718_s27, 256  ;;  %p720_p11 = scmp.lt.s32.totalorder %s898_s6, %s718_s27 }
  0x23   : > { %p715_p4 = pnand %p713_p2, %p699_p3  ;;  %p721_p5 = scmp.lt.s32.totalorder %s719_s28, %s712_s22 }
  0x25   : > { %p716_p12 = pneg %p715_p4  ;;  %p722_p8 = por %p721_p5, %p720_p11 }
  0x27   : > { %p723_p9 = pnand %p722_p8, %p716_p12 }
  0x29   : > { %726 = shalt.err (!%p723_p9)
}
  0x2a   : > { %643 = dma.hbm_to_vmem [thread:$0]  (!%p894_p13), %s890_s4, 128, %s898_s6, %s138_s8  }
  0x2b   : > { %p1153_p0 = scmp.lt.s32.totalorder %s793_s15, 3  ;;  %p1154_p1 = scmp.ge.s32.totalorder %s793_s15, 1 }
  0x2d   : > { %p155_p3 = pnand %p1154_p1, %p1153_p0 }
  0x2e   : > { %s932_s29 = sand.u32 (!%p155_p3), 1, %s785_s13  }
  0x2f   : > { %158 = sbr.rel (%p155_p3) target bundleno = 695 (0x2b7), region = 32  ;;  %s616_s30 = sshll.u32 (!%p155_p3), %s932_s29, 3 }
  0x30   : > { %s161_s5 = scalar_lea.sflag (!%p155_p3), [#allocation4], %s932_s29  ;;  %s164_s9 = scalar_lea.vmem (!%p155_p3), [#allocation3], %s616_s30 }
  0x36   : > { %772 = dma.done.wait (%p870_p6), %s161_s5, 128  }
  0x37   : > { %774 = vsyncadd (%p870_p6), %s161_s5, 4294967168  ;;  %v192_v0 = vld [vmem:[%s164_s9] sm:$0xff]  ;;  %s796_s4 = smov 16   ;;  %s797_s6 = smov 1   ;;  %v804_v3 = vmov 0.0   ;;  %v370_v4 = vld [vmem:[%s1145_s2] sm:$0xff]  ;;  %v187_v6 = vlaneseq }
  0x38   : > { %v193_v1 = vmax.f32 %v192_v0, 0.0  ;;  %s798_s7 = smov 17   ;;  %s799_s8 = smov 15   ;;  %451 = vmatprep.mubr.f32.mxu0 %v804_v3  ;;  %v805_v5 = vmov 0  }
  0x39   : > { %s800_s23 = smov 127   ;;  %s801_s10 = smov 112   ;;  %692 = vset.pattern.permute.xlu0 %v805_v5  ;;  %v952_v7 = vand.u32 127, %v187_v6 }
  0x3a   : > { %218 = vrot.lane.b32.xlu1 %v193_v1, %s796_s4  ;;  %279 = vst [vmem:[#allocation2 + $0x20] sm:$0xf] %v193_v1  ;;  %258 = vrot.lane.b32.xlu0 %v193_v1, %s797_s6  ;;  %v195_v2 = vcombine.high %v193_v1, %v193_v1  ;;  %s802_s11 = smov 113   ;;  %s803_s17 = smov 111  }
  0x3b   : > { %v955_v8 = vadd.s32 128, %v952_v7  ;;  %v958_v11 = vand.u32 15, %v952_v7  ;;  %vm222_vm0 = vcmp.lt.s32.totalorder %v952_v7, 16  ;;  %vm204_vm1 = vcmp.ge.s32.totalorder %v952_v7, 16  ;;  %s617_s27 = sshll.u32 %s932_s29, 4  ;;  %s627_s28 = sshll.u32 %s848_s16, 8 }
  0x3c   : > { %280 = vst [vmem:[#allocation2 + $0x28] sm:$0xf] %v195_v2  ;;  %vm201_vm3 = vcmp.lt.s32.totalorder %v952_v7, 17  ;;  %vm243_vm7 = vcmp.lt.s32.totalorder %v952_v7, 15  ;;  %vm262_vm8 = vcmp.lt.s32.totalorder %v952_v7, 1  ;;  %vm285_vm11 = vcmp.lt.s32.totalorder %v952_v7, 127 }
  0x3d   : > { %v963_v12 = vand.u32 15, %v955_v8  ;;  %vm206_vm2 = vcmp.ge.s32.totalorder %v958_v11, 1  ;;  %vm246_vm6 = vcmp.lt.s32.totalorder %v958_v11, 15  ;;  %vm325_vm12 = vcmp.lt.s32.totalorder %v952_v7, 112  ;;  %s186_s30 = scalar_lea.vmem [#allocation6], %s617_s27  ;;  %p1157_p11 = scmp.ne.s32.totalorder %s1150_s24, 0 }
  0x3e   : > { %197 = vrot.lane.b32.xlu0 %v193_v1, %s798_s7  ;;  %220 = vrot.lane.b32.xlu1 %v195_v2, %s796_s4  ;;  %vm208_vm5 = vmand %vm204_vm1, %vm206_vm2  ;;  %vm310_vm13 = vcmp.lt.s32.totalorder %v955_v8, 240  ;;  %vm306_vm14 = vcmp.lt.s32.totalorder %v952_v7, 113  ;;  %s539_s5 = sshll.u32 %s186_s30, 4  ;;  %s806_s16 = smov [#allocation6]   ;;  %s1101_s5 = int_to_ptr.vmem [resolvable:$true] %s539_s5 }
  0x3f   : > { %vm207_vm4 = vcmp.ge.s32.totalorder %v963_v12, 1  ;;  %vm247_vm9 = vcmp.lt.s32.totalorder %v963_v12, 15  ;;  %vm248_vm10 = vmand %vm204_vm1, %vm246_vm6 }
  0x40   : > { %vm1020_vm15 = vmand %vm310_vm13, %vm207_vm4 }
  0x42   : > { %239 = vrot.lane.b32.xlu0 %v193_v1, %s799_s8  ;;  %199 = vrot.lane.b32.xlu1 %v195_v2, %s798_s7  ;;  %s525_s7 = scalar_lea.sflag [#allocation5], %s932_s29 }
  0x46   : > { %241 = vrot.lane.b32.xlu1 %v195_v2, %s799_s8  ;;  %260 = vrot.lane.b32.xlu0 %v195_v2, %s797_s6  ;;  %s727_s8 = scalar_lea.vmem %s1101_s5, 256 }
  0x47   : > { %p728_p6 = scmp.ne.s32.totalorder %s1101_s5, %s727_s8 }
  0x49   : > { %p729_p12 = pnand %p728_p6, %p1157_p11 }
  0x4a   : > { %283 = vrot.lane.b32.xlu1 %v195_v2, %s800_s23  ;;  %281 = vrot.lane.b32.xlu0 %v193_v1, %s800_s23 }
  0x4b   : > { %p730_p13 = pneg %p729_p12 }
  0x4e   : > { %323 = vrot.lane.b32.xlu1 %v195_v2, %s801_s10  ;;  %321 = vrot.lane.b32.xlu0 %v193_v1, %s801_s10 }
  0x52   : > { %304 = vrot.lane.b32.xlu1 %v195_v2, %s802_s11  ;;  %302 = vrot.lane.b32.xlu0 %v193_v1, %s802_s11 }
  0x56   : > { %344 = vrot.lane.b32.xlu1 %v195_v2, %s803_s17  ;;  %342 = vrot.lane.b32.xlu0 %v193_v1, %s803_s17 }
  0x5a   : > { %373 = vperm.xlu0 %692, %v370_v4  }
  0xac   : > { %v219_v9 = vpop.permute.xlu1 %218  ;;  %v259_v10 = vpop.permute.xlu0 %258 }
  0xb0   : > { %v198_v13 = vpop.permute.xlu0 %197  ;;  %v221_v14 = vpop.permute.xlu1 %220 }
  0xb1   : > { %v223_v15 = vsel %vm222_vm0, %v219_v9, %v221_v14  ;;  %v224_v16 = vsel %vm222_vm0, %v221_v14, %v219_v9 }
  0xb2   : > { %v229_v17 = vsel %vm204_vm1, %v224_v16, 0.0  ;;  %v234_v18 = vrot.slane %v223_v15, 4 }
  0xb3   : > { %v233_v19 = vrot.slane %v229_v17, 4 }
  0xb4   : > { %238 = vst [vmem:[#allocation2 + $0x8] sm:$0xf0] %v234_v18  ;;  %v240_v20 = vpop.permute.xlu0 %239  ;;  %v200_v21 = vpop.permute.xlu1 %199 }
  0xb5   : > { %237 = vst [vmem:[#allocation2] sm:$0xf0] %v233_v19  ;;  %v202_v22 = vsel %vm201_vm3, %v198_v13, %v200_v21  ;;  %v203_v23 = vsel %vm201_vm3, %v200_v21, %v198_v13  ;;  %vm346_vm3 = vcmp.lt.s32.totalorder %v952_v7, 111  ;;  %v359_v21 = vld [vmem:[%s1144_s1] sm:$0xff] }
  0xb6   : > { %v214_v24 = vsel %vm208_vm5, %v203_v23, 0.0  ;;  %v215_v25 = vsel %vm207_vm4, %v202_v22, 0.0  ;;  %vm350_vm5 = vmand %vm310_vm13, %vm247_vm9 }
  0xb7   : > { %216 = vst [vmem:[#allocation2] sm:$0xf] %v214_v24  ;;  %217 = vst [vmem:[#allocation2 + $0x8] sm:$0xf] %v215_v25 }
  0xb8   : > { %v242_v26 = vpop.permute.xlu1 %241  ;;  %v261_v27 = vpop.permute.xlu0 %260 }
  0xb9   : > { %v244_v28 = vsel %vm243_vm7, %v240_v20, %v242_v26  ;;  %v245_v29 = vsel %vm243_vm7, %v242_v26, %v240_v20  ;;  %v263_v30 = vsel %vm262_vm8, %v259_v10, %v261_v27  ;;  %v264_v31 = vsel %vm262_vm8, %v261_v27, %v259_v10 }
  0xba   : > { %v254_v32 = vsel %vm248_vm10, %v245_v29, 0.0  ;;  %v255_v33 = vsel %vm247_vm9, %v244_v28, 0.0  ;;  %v269_v34 = vsel %vm206_vm2, %v264_v31, 0.0  ;;  %v270_v35 = vsel %vm207_vm4, %v263_v30, 0.0 }
  0xbb   : > { %256 = vst [vmem:[#allocation2 + $0x10] sm:$0xf] %v254_v32  ;;  %257 = vst [vmem:[#allocation2 + $0x18] sm:$0xf] %v255_v33  ;;  %v273_v36 = vrot.slane %v269_v34, 4  ;;  %v274_v37 = vrot.slane %v270_v35, 4 }
  0xbc   : > { %v284_v38 = vpop.permute.xlu1 %283  ;;  %v282_v39 = vpop.permute.xlu0 %281  ;;  %vm380_vm7 = vcmask 1043456   ;;  %vm467_vm10 = vcmp.le.s32.totalorder %v963_v12, 14 }
  0xbd   : > { %277 = vst [vmem:[#allocation2 + $0x10] sm:$0xf0] %v273_v36  ;;  %278 = vst [vmem:[#allocation2 + $0x18] sm:$0xf0] %v274_v37  ;;  %v286_v40 = vsel %vm285_vm11, %v282_v39, %v284_v38  ;;  %v287_v41 = vsel %vm285_vm11, %v284_v38, %v282_v39 }
  0xbe   : > { %v292_v42 = vsel %vm246_vm6, %v286_v40, 0.0  ;;  %v293_v43 = vsel %vm247_vm9, %v287_v41, 0.0  ;;  %v361_v54 = vld [vmem:[#allocation2 + $0x8] sm:$0xff]  ;;  %v360_v58 = vld [vmem:[#allocation2] sm:$0xff]  ;;  %vm466_vm9 = vcmp.le.s32.totalorder %v958_v11, 14 }
  0xbf   : > { %v296_v44 = vrot.slane %v292_v42, 4  ;;  %v297_v45 = vrot.slane %v293_v43, 4  ;;  %v225_v43 = vsel %vm204_vm1, 1, %v805_v5 }
  0xc0   : > { %v324_v46 = vpop.permute.xlu1 %323  ;;  %v322_v47 = vpop.permute.xlu0 %321 }
  0xc1   : > { %300 = vst [vmem:[#allocation2 + $0x20] sm:$0xf0] %v296_v44  ;;  %301 = vst [vmem:[#allocation2 + $0x28] sm:$0xf0] %v297_v45  ;;  %v326_v48 = vsel %vm325_vm12, %v322_v47, %v324_v46  ;;  %v327_v49 = vsel %vm325_vm12, %v324_v46, %v322_v47  ;;  %v265_v44 = vsel %vm206_vm2, 1, %v805_v5  ;;  %v266_v45 = vsel %vm207_vm4, 1, %v805_v5 }
  0xc2   : > { %v333_v50 = vsel %vm310_vm13, %v327_v49, 0.0  ;;  %v336_v51 = vrot.slane %v326_v48, 4  ;;  %v504_v46 = vadd.s32 1, %v265_v44  ;;  %v510_v47 = vadd.s32 1, %v225_v43 }
  0xc3   : > { %v337_v52 = vrot.slane %v333_v50, 4  ;;  %v474_v48 = vsel %vm466_vm9, 1, %v805_v5  ;;  %v505_v49 = vadd.s32 1, %v266_v45  ;;  %v329_v50 = vsel %vm310_vm13, 1, %v805_v5 }
  0xc4   : > { %340 = vst [vmem:[#allocation2 + $0x30] sm:$0xf0] %v336_v51  ;;  %v305_v55 = vpop.permute.xlu1 %304  ;;  %v303_v56 = vpop.permute.xlu0 %302  ;;  %v363_v57 = vld [vmem:[#allocation2 + $0x18] sm:$0xff]  ;;  %v362_v59 = vld [vmem:[#allocation2 + $0x10] sm:$0xff]  ;;  %v475_v51 = vsel %vm467_vm10, 1, %v805_v5  ;;  %v512_v53 = vadd.s32 1, %v510_v47 }
  0xc5   : > { %341 = vst [vmem:[#allocation2 + $0x38] sm:$0xf0] %v337_v52  ;;  %v307_v60 = vsel %vm306_vm14, %v303_v56, %v305_v55  ;;  %v308_v61 = vsel %vm306_vm14, %v305_v55, %v303_v56  ;;  %v628_v62 = vpack.c.bf16 %v363_v57, %v361_v54  ;;  %v630_v63 = vpack.c.bf16 %v362_v59, %v360_v58 }
  0xc6   : > { %v317_v0 = vsel %vm206_vm2, %v307_v60, 0.0  ;;  %v318_v1 = vsel %vm1020_vm15, %v308_v61, 0.0  ;;  %v506_v52 = vadd.s32 %v504_v46, %v474_v48  ;;  %v507_v54 = vadd.s32 %v505_v49, %v475_v51 }
  0xc7   : > { %319 = vst [vmem:[#allocation2 + $0x30] sm:$0xf] %v317_v0  ;;  %320 = vst [vmem:[#allocation2 + $0x38] sm:$0xf] %v318_v1  ;;  %629 = vmatprep.subr.bf16.mxu0 %v628_v62  ;;  %v513_v55 = vadd.s32 2, %v329_v50  ;;  %v514_v57 = vcvt.s32.f32 %v512_v53 }
  0xc8   : > { %631 = vmatpush1.bf16.msra.mxu0 %v630_v63  ;;  %v345_v2 = vpop.permute.xlu1 %344  ;;  %v343_v3 = vpop.permute.xlu0 %342  ;;  %v365_v13 = vld [vmem:[#allocation2 + $0x28] sm:$0xff]  ;;  %v364_v15 = vld [vmem:[#allocation2 + $0x20] sm:$0xff]  ;;  %v508_v56 = vcvt.s32.f32 %v506_v52  ;;  %v509_v58 = vcvt.s32.f32 %v507_v54 }
  0xc9   : > { %v347_v4 = vsel %vm346_vm3, %v343_v3, %v345_v2  ;;  %v348_v6 = vsel %vm346_vm3, %v345_v2, %v343_v3  ;;  %v515_v59 = vcvt.s32.f32 %v513_v55 }
  0xca   : > { %v355_v9 = vsel %vm246_vm6, %v347_v4, 0.0  ;;  %v356_v10 = vsel %vm350_vm5, %v348_v6, 0.0  ;;  %vm376_vm6 = vcmask 293888   ;;  %v516_v11 = vmul.f32 %v514_v57, %v508_v56 }
  0xcb   : > { %357 = vst [vmem:[#allocation2 + $0x40] sm:$0xf] %v355_v9  ;;  %358 = vst [vmem:[#allocation2 + $0x48] sm:$0xf] %v356_v10  ;;  %v517_v60 = vmul.f32 %v515_v59, %v509_v58 }
  0xcc   : > { %693 = vrcp.f32 %v516_v11 }
  0xcd   : > { %695 = vrcp.f32 %v517_v60 }
  0xce   : > { %v367_v14 = vld [vmem:[#allocation2 + $0x38] sm:$0xff]  ;;  %v366_v16 = vld [vmem:[#allocation2 + $0x30] sm:$0xff] }
  0xcf   : > { %v632_v17 = vpack.c.bf16 %v367_v14, %v365_v13  ;;  %v634_v18 = vpack.c.bf16 %v366_v16, %v364_v15 }
  0xd1   : > { %633 = vmatprep.subr.bf16.mxu0 %v632_v17 }
  0xd2   : > { %635 = vmatpush1.bf16.msra.mxu0 %v634_v18  ;;  %v369_v19 = vld [vmem:[#allocation2 + $0x48] sm:$0xf]  ;;  %v368_v20 = vld [vmem:[#allocation2 + $0x40] sm:$0xf] }
  0xd3   : > { %618 = vmatprep.subr.msk.mxu0 %vm380_vm7, %v369_v19 }
  0xd6   : > { %619 = vmatpush1.msk.msra.mxu0 %vm380_vm7, %v368_v20  ;;  %v694_v3 = vpop.eup %693 }
  0xd7   : > { %620 = vmatmul.mubr.msk.f32.vlgmr.msra.gmra.mrb[0].mxu0 %vm376_vm6, %v359_v21  ;;  %v696_v10 = vpop.eup %695 }
  0xd9   : > { %v374_v22 = vpop.permute.xlu0 %373 }
 0x1aa   : > { %v453_v23 = vpop.f32.mrb[0].mxu0 }
 0x1ab   : > { %v454_v24 = vadd.f32 %v453_v23, %v374_v22  ;;  %v455_v25 = vpop.f32.mrb[1].mxu0 }
 0x1ac   : > { %v456_v26 = vadd.f32 %v455_v25, %v374_v22 }
 0x1ad   : > { %468 = vrot.lane.b32.xlu0 %v454_v24, %s800_s23  ;;  %458 = vrot.lane.b32.xlu1 %v454_v24, %s797_s6 }
 0x1b1   : > { %460 = vrot.lane.b32.xlu1 %v456_v26, %s797_s6  ;;  %s1099_s6 = scalar_lea.hbm %s1146_s3, %s627_s28 }
 0x1b5   : > { %470 = vrot.lane.b32.xlu1 %v456_v26, %s800_s23  ;;  %s731_s23 = sshll.u32 %s806_s16, 4  ;;  %s732_s23 = int_to_ptr.vmem [resolvable:$false] %s731_s23 }
 0x1b6   : > { %p734_p7 = scmp.lt.s32.totalorder %s1101_s5, %s732_s23 }
 0x21f   : > { %v459_v27 = vpop.permute.xlu1 %458  ;;  %v469_v33 = vpop.permute.xlu0 %468 }
 0x223   : > { %v461_v28 = vpop.permute.xlu1 %460 }
 0x224   : > { %v462_v29 = vsel %vm262_vm8, %v459_v27, %v461_v28  ;;  %v463_v30 = vsel %vm262_vm8, %v461_v28, %v459_v27 }
 0x225   : > { %v464_v31 = vsel %vm206_vm2, %v463_v30, 0.0  ;;  %v465_v32 = vsel %vm207_vm4, %v462_v29, 0.0 }
 0x226   : > { %v480_v35 = vadd.f32 %v464_v31, %v454_v24  ;;  %v481_v36 = vadd.f32 %v465_v32, %v456_v26 }
 0x227   : > { %v471_v34 = vpop.permute.xlu1 %470 }
 0x228   : > { %v472_v37 = vsel %vm285_vm11, %v469_v33, %v471_v34  ;;  %v473_v38 = vsel %vm285_vm11, %v471_v34, %v469_v33 }
 0x229   : > { %v478_v39 = vsel %vm466_vm9, %v472_v37, 0.0  ;;  %v479_v40 = vsel %vm467_vm10, %v473_v38, 0.0 }
 0x22a   : > { %v482_v41 = vadd.f32 %v480_v35, %v478_v39  ;;  %v483_v42 = vadd.f32 %v481_v36, %v479_v40 }
 0x22c   : > { %486 = vrot.lane.b32.xlu1 %v483_v42, %s796_s4  ;;  %484 = vrot.lane.b32.xlu0 %v482_v41, %s796_s4 }
 0x230   : > { %494 = vrot.lane.b32.xlu1 %v483_v42, %s801_s10  ;;  %492 = vrot.lane.b32.xlu0 %v482_v41, %s801_s10  ;;  %s733_s10 = scalar_lea.vmem %s732_s23, 512 }
 0x231   : > { %p735_p10 = scmp.lt.s32.totalorder %s733_s10, %s727_s8 }
 0x233   : > { %p736_p2 = por %p735_p10, %p734_p7 }
 0x235   : > { %p737_p4 = pnand %p736_p2, %p730_p13 }
 0x29e   : > { %v487_v61 = vpop.permute.xlu1 %486  ;;  %v485_v62 = vpop.permute.xlu0 %484 }
 0x29f   : > { %v489_v12 = vsel %vm222_vm0, %v487_v61, %v485_v62  ;;  %v488_v5 = vsel %vm222_vm0, %v485_v62, %v487_v61 }
 0x2a0   : > { %v490_v63 = vsel %vm204_vm1, %v489_v12, 0.0  ;;  %v501_v4 = vadd.f32 %v488_v5, %v483_v42 }
 0x2a1   : > { %v500_v0 = vadd.f32 %v490_v63, %v482_v41 }
 0x2a2   : > { %v495_v1 = vpop.permute.xlu1 %494  ;;  %v493_v2 = vpop.permute.xlu0 %492 }
 0x2a3   : > { %v496_v6 = vsel %vm325_vm12, %v493_v2, %v495_v1  ;;  %v497_v9 = vsel %vm325_vm12, %v495_v1, %v493_v2 }
 0x2a4   : > { %v499_v13 = vsel %vm310_vm13, %v497_v9, 0.0  ;;  %v502_v14 = vadd.f32 %v500_v0, %v496_v6 }
 0x2a5   : > { %v503_v15 = vadd.f32 %v501_v4, %v499_v13 }
 0x2a6   : > { %v519_v16 = vmul.f32 %v694_v3, %v502_v14 }
 0x2a7   : > { %v521_v17 = vmul.f32 %v696_v10, %v503_v15 }
 0x2a8   : > { %522 = vst [vmem:[%s186_s30] sm:$0xff] %v519_v16 }
 0x2a9   : > { %523 = vst [vmem:[%s186_s30 + $0x8] sm:$0xff] %v521_v17 }
 0x2aa   : > { %740 = shalt.err (!%p737_p4)
}
 0x2ab   : > { %s741_s29 = scalar_lea.hbm %s1099_s6, 256  ;;  %s745_s19 = scalar_lea.hbm %s1146_s3, 512 }
 0x2ac   : > { %p742_p5 = scmp.ne.s32.totalorder %s1099_s6, %s741_s29  ;;  %p746_p0 = scmp.lt.u32.totalorder %s1099_s6, %s1146_s3 }
 0x2ad   : > { %p747_p1 = scmp.lt.u32.totalorder %s745_s19, %s741_s29  ;;  %p749_p6 = scmp.lt.u32.totalorder %s741_s29, %s1099_s6 }
 0x2ae   : > { %p743_p8 = pnand %p742_p5, %p1157_p11 }
 0x2af   : > { %p748_p3 = por %p747_p1, %p746_p0 }
 0x2b0   : > { %p744_p9 = pneg %p743_p8 }
 0x2b1   : > { %p750_p12 = por %p749_p6, %p748_p3 }
 0x2b3   : > { %p751_p13 = pnand %p750_p12, %p744_p9 }
 0x2b5   : > { %754 = shalt.err (!%p751_p13)
}
 0x2b6   : > { %638 = dma.vmem_to_hbm [thread:$0]  (%p1157_p11), %s1101_s5, 256, %s1099_s6, %s525_s7  }
 0x2b7 PF: > { %s551_s26 = sand.u32 1, %s781_s12   ;;  %p1158_p7 = scmp.ne.s32.totalorder %s1151_s25, 0 }
 0x2b8   : > { %p1159_p10 = scmp.ge.s32.totalorder %s793_s15, 2  ;;  %s552_s27 = scalar_lea.sflag [#allocation5], %s551_s26 }
 0x2ba   : > { %p645_p2 = pnand %p1159_p10, %p1158_p7 }
 0x2bc   : > { %776 = dma.done.wait (!%p645_p2), %s552_s27, 256  }
 0x2bd   : > { %778 = vsyncadd (!%p645_p2), %s552_s27, 4294967040  ;;  %p16_p4 = scmp.ge.s32.totalorder %s852_s18, 4   ;;  %s1160_s12 = smov %s785_s13 }
 0x2be   : > { %s1161_s13 = smov %s789_s14  ;;  %s1162_s14 = smov %s864_s21 }
 0x2bf   : > { %s1163_s15 = smov %s852_s18  ;;  %18 = sbr.rel (!%p16_p4) target bundleno = 5 (0x5), region = 77 }
 0x2c6   :  { %557 = vsyncpa [#allocation4], 1 }
 0x2c7   :  { %559 = vsyncpa [#allocation4 + $0x1], 1 }
 0x2c8   :  { %560 = vsyncpa [#allocation5], 1 }
 0x2c9   :  { %562 = vsyncpa [#allocation5 + $0x1], 1 }

</bundles_post_ra>
